<compile_context>
chip_gen: v7x
topology: tpu7x:2x2x1
jax: 0.10.0
libtpu: 0.0.40
codegen_flags: <defaults>
</compile_context>

<pallas_src>
import functools

import jax
import jax.numpy as jnp
from jax import lax
from jax.experimental import pallas as pl
from jax.experimental.pallas import tpu as pltpu

TEMPERATURE = 0.05        # has no effect on the returned loss value (logZ cancels); kept for parity
BASE_TEMPERATURE = 0.05   # unused by forward (parity with the module __init__)
CUTOFF = 2


def _supsimcse_kernel(n_rows, block_n,            # static (baked via functools.partial)
                      target_ref,                 # scalar-prefetch: (1,) int32 in SMEM
                      f1_ref, f2_ref,             # (block_n, D) tiles in VMEM (auto-pipelined)
                      loss_ref,                   # (1, 1) f32 output in VMEM
                      m_ref, l_ref, st_ref        # (1, 1) f32 VMEM scratch: max / sum-exp / sim[target]
                      ):
    i = pl.program_id(0)

    # Row-wise dot products for this tile: diag(f1 @ f2.T) restricted to the tile rows.
    # Elementwise VPU multiply + XLU lane-reduce; accumulate in f32 regardless of input dtype.
    sim = jnp.sum(f1_ref[...].astype(jnp.float32) * f2_ref[...].astype(jnp.float32),
                  axis=1, keepdims=True)                                     # (block_n, 1)

    if n_rows % block_n != 0:
        # Static (trace-time) branch: only compiled in for ragged N.  Rows past the array end in
        # the last (partial) tile hold unspecified data; force their logits to -inf so they
        # contribute exactly 0 to the streaming logsumexp.
        row = i * block_n + lax.broadcasted_iota(jnp.int32, (block_n, 1), 0)
        sim = jnp.where(row < n_rows, sim, -jnp.inf)

    @pl.when(i == 0)
    def _init():
        m_ref[...] = jnp.full_like(m_ref, -jnp.inf)
        l_ref[...] = jnp.zeros_like(l_ref)
        # target = int(label > cutoff) in {0, 1}; both candidate rows live in tile 0 (block_n >= 2),
        # and both (1,1) slices are already computed in `sim` -> a single scalar select, no extra
        # dot products or cross-lane work.
        # TODO(synk): PyTorch F.cross_entropy requires a Long target; the bool (label > cutoff)
        #             is interpreted here as the class index 0/1 implied by the reference.
        st_ref[...] = jnp.where(target_ref[0] == 0, sim[0:1, :], sim[1:2, :])

    # Online (streaming) logsumexp over sim across the N-tiles.  All exp/log stay vector-shaped
    # (EUP work on (block_n,1)/(1,1) tiles); no scalar-float transcendentals.
    m_prev = m_ref[...]                                                      # (1, 1)
    m_new = jnp.maximum(m_prev, jnp.max(sim, axis=0, keepdims=True))         # (1, 1)
    l_ref[...] = (l_ref[...] * jnp.exp(m_prev - m_new)
                  + jnp.sum(jnp.exp(sim - m_new), axis=0, keepdims=True))    # (1, 1)
    m_ref[...] = m_new

    @pl.when(i == pl.num_programs(0) - 1)
    def _finalize():
        # loss = logsumexp(log_prob) - log_prob[target]
        #      = (logsumexp(sim) - logZ) - (sim[target] - logZ)
        #      = logsumexp(sim) - sim[target]
        # The log-partition term logZ = log(sum_i exp(sim_i / T)) of the reference cancels
        # exactly, so it is never materialized (also avoids the exp(sim / 0.05) overflow).
        # NOTE: this (1,1) store is a masked partial vst; it runs once per call -> negligible.
        loss_ref[...] = (m_ref[...] + jnp.log(l_ref[...])) - st_ref[...]


def supsimcse_forward(f1, f2, label, cutoff=CUTOFF,
                      temperature=TEMPERATURE, block_n=512):
    """f1, f2: (N, D) arrays; label: scalar / (1,) array.  Returns (loss, 0, 0) like the module.

    `temperature` is accepted for signature parity but mathematically cancels out of the loss
    (cross-entropy is shift-invariant in its logits), so it never enters the kernel.

    block_n: rows per grid step.  Auto-clamped so 2 inputs x 2 pipeline buffers x block_n*D*4B
    stays well under the scoped VMEM limit (16 MiB default v5e, 32 MiB v6e/v7x).
    """
    N, D = f1.shape
    assert f2.shape == (N, D), "f1 / f2 must share the same (N, D) shape"
    assert N >= 2, "need >= 2 rows: the cross-entropy target is a class index in {0, 1}"

    # ---- tile-size selection (memory-bound: biggest tile that comfortably fits VMEM) ----
    vmem_budget_bytes = 8 * 1024 * 1024                       # for the 4 pipelined (block_n, D) buffers
    bytes_per_row = D * 4
    rows_cap = max(8, (vmem_budget_bytes // (4 * bytes_per_row)) // 8 * 8)
    block_n = max(8, min(block_n, rows_cap))
    if block_n >= N:
        block_n = N                                           # single tile; full-dim block is always legal
    else:
        block_n = max(8, (block_n // 8) * 8)                  # (8, 128) sublane-tiling constraint
    grid = (pl.cdiv(N, block_n),)                             # ragged last tile handled by in-kernel mask

    # target = int(label > cutoff) in {0, 1}: one scalar compare done in the wrapper so the
    # kernel supports any label / cutoff dtype; prefetched into SMEM.
    target = (jnp.asarray(label).reshape(-1)[0] > cutoff).astype(jnp.int32).reshape(1)

    kernel = functools.partial(_supsimcse_kernel, N, block_n)

    loss = pl.pallas_call(
        kernel,
        out_shape=jax.ShapeDtypeStruct((1, 1), jnp.float32),
        grid_spec=pltpu.PrefetchScalarGridSpec(
            num_scalar_prefetch=1,                            # target lands in SMEM
            grid=grid,
            in_specs=[
                pl.BlockSpec((block_n, D), lambda i, tgt: (i, 0)),   # f1 tile
                pl.BlockSpec((block_n, D), lambda i, tgt: (i, 0)),   # f2 tile
            ],
            # Same (0,0) block every step -> scalar output stays resident across the reduction
            # axis and is written back once after the last grid step.
            out_specs=pl.BlockSpec((1, 1), lambda i, tgt: (0, 0)),
            scratch_shapes=[
                pltpu.VMEM((1, 1), jnp.float32),   # running max of sim
                pltpu.VMEM((1, 1), jnp.float32),   # running sum of exp(sim - max)
                pltpu.VMEM((1, 1), jnp.float32),   # sim[target]
            ],
        ),
        compiler_params=pltpu.CompilerParams(
            dimension_semantics=("arbitrary",),    # sequential online reduction over N tiles
        ),
    )(target, f1, f2)
    return loss[0, 0], 0, 0


def _reference(f1, f2, label, cutoff=CUTOFF):
    # Pure-JAX reference mirroring the PyTorch module line-by-line.  Finite as long as
    # exp(sim / T) does not overflow, which holds for cosine-normalized features.
    sim = jnp.diag(f1 @ f2.T)
    exp_logits = jnp.exp(sim / TEMPERATURE)
    log_prob = sim - jnp.log(jnp.sum(exp_logits))
    target = (jnp.asarray(label).reshape(-1)[0] > cutoff).astype(jnp.int32)
    return jax.nn.logsumexp(log_prob) - log_prob[target]


if __name__ == "__main__":
    key = jax.random.PRNGKey(0)
    k1, k2 = jax.random.split(key)

    # Sentence-embedding-like shapes: batch of 64 pairs, hidden size 128.
    N, D = 64, 128
    f1 = jax.random.normal(k1, (N, D), dtype=jnp.float32)
    f2 = jax.random.normal(k2, (N, D), dtype=jnp.float32)
    # feature_sim='cosine': L2-normalize so sim is a cosine similarity in [-1, 1]
    # (this also keeps the PyTorch-style exp(sim / 0.05) reference finite).
    f1 = f1 / jnp.linalg.norm(f1, axis=1, keepdims=True)
    f2 = f2 / jnp.linalg.norm(f2, axis=1, keepdims=True)

    # Case 1: label > cutoff -> target class 1   (block_n=16 -> 4-step streaming grid)
    label_hi = jnp.array([5], dtype=jnp.int32)
    loss_hi, z0, z1 = supsimcse_forward(f1, f2, label_hi, block_n=16)
    loss_hi = jax.block_until_ready(loss_hi)
    ref_hi = jax.block_until_ready(_reference(f1, f2, label_hi))
    assert jnp.isfinite(loss_hi), loss_hi
    assert jnp.allclose(loss_hi, ref_hi, rtol=1e-4, atol=1e-4), (loss_hi, ref_hi)
    assert z0 == 0 and z1 == 0

    # Case 2: label <= cutoff -> target class 0
    label_lo = jnp.array([1], dtype=jnp.int32)
    loss_lo, _, _ = supsimcse_forward(f1, f2, label_lo, block_n=16)
    loss_lo = jax.block_until_ready(loss_lo)
    ref_lo = jax.block_until_ready(_reference(f1, f2, label_lo))
    assert jnp.isfinite(loss_lo), loss_lo
    assert jnp.allclose(loss_lo, ref_lo, rtol=1e-4, atol=1e-4), (loss_lo, ref_lo)

    # Case 3: ragged N (not a multiple of block_n) -> exercises the in-kernel row-mask path
    Nr = 60
    loss_rg, _, _ = supsimcse_forward(f1[:Nr], f2[:Nr], label_hi, block_n=16)
    loss_rg = jax.block_until_ready(loss_rg)
    ref_rg = jax.block_until_ready(_reference(f1[:Nr], f2[:Nr], label_hi))
    assert jnp.isfinite(loss_rg), loss_rg
    assert jnp.allclose(loss_rg, ref_rg, rtol=1e-4, atol=1e-4), (loss_rg, ref_rg)

    # Case 4: default block_n -> whole batch in a single VMEM tile
    loss_one, _, _ = supsimcse_forward(f1, f2, label_lo)
    loss_one = jax.block_until_ready(loss_one)
    assert jnp.allclose(loss_one, ref_lo, rtol=1e-4, atol=1e-4), (loss_one, ref_lo)

    print("KERNEL_OK")
</pallas_src>

<mosaic_0001>
module attributes {stable_mosaic.version = 11 : i64} {
  func.func @_supsimcse_kernel(%arg0: i32, %arg1: memref<1xi32, #tpu.memory_space<smem>>, %arg2: memref<16x128xf32, #tpu.memory_space<vmem>>, %arg3: memref<16x128xf32, #tpu.memory_space<vmem>>, %arg4: memref<1x1xf32, #tpu.memory_space<vmem>>, %arg5: memref<1x1xf32, #tpu.memory_space<vmem>>, %arg6: memref<1x1xf32, #tpu.memory_space<vmem>>, %arg7: memref<1x1xf32, #tpu.memory_space<vmem>>) attributes {dimension_semantics = [#tpu.dimension_semantics<arbitrary>], iteration_bounds = array<i64: 4>, scalar_prefetch = 1 : i64, scratch_operands = 3 : i64, tpu.core_type = #tpu.core_type<tc>, window_params = [{transform_indices = @transform_0, window_bounds = array<i64: 16, 128>}, {transform_indices = @transform_1, window_bounds = array<i64: 16, 128>}, {pipeline_mode = #tpu.pipeline_mode<synchronous>, transform_indices = @transform_2, window_bounds = array<i64: 1, 1>}]} {
    %c0 = arith.constant 0 : index
    %c0_0 = arith.constant 0 : index
    %0 = vector.load %arg2[%c0, %c0_0] : memref<16x128xf32, #tpu.memory_space<vmem>>, vector<16x128xf32>
    %c0_1 = arith.constant 0 : index
    %c0_2 = arith.constant 0 : index
    %1 = vector.load %arg3[%c0_1, %c0_2] : memref<16x128xf32, #tpu.memory_space<vmem>>, vector<16x128xf32>
    %2 = arith.mulf %0, %1 : vector<16x128xf32>
    %cst = arith.constant dense<0.000000e+00> : vector<16xf32>
    %3 = vector.multi_reduction <add>, %2, %cst [1] : vector<16x128xf32> to vector<16xf32>
    %4 = vector.shape_cast %3 : vector<16xf32> to vector<16x1xf32>
    %c0_i32 = arith.constant 0 : i32
    %5 = arith.cmpi eq, %arg0, %c0_i32 : i32
    %6 = arith.extui %5 : i1 to i32
    %c0_i32_3 = arith.constant 0 : i32
    %7 = arith.cmpi ne, %6, %c0_i32_3 : i32
    scf.if %7 {
      %cst_15 = arith.constant 0xFF800000 : f32
      %27 = vector.broadcast %cst_15 : f32 to vector<1x1xf32>
      %c0_16 = arith.constant 0 : index
      %c0_17 = arith.constant 0 : index
      %28 = vector.load %arg5[%c0_16, %c0_17] : memref<1x1xf32, #tpu.memory_space<vmem>>, vector<1x1xf32>
      tpu.vector_store %arg5[%c0_16, %c0_17], %27 {strides = array<i32>} : memref<1x1xf32, #tpu.memory_space<vmem>>, vector<1x1xf32>,
      %cst_18 = arith.constant 0.000000e+00 : f32
      %29 = vector.broadcast %cst_18 : f32 to vector<1x1xf32>
      %c0_19 = arith.constant 0 : index
      %c0_20 = arith.constant 0 : index
      %30 = vector.load %arg6[%c0_19, %c0_20] : memref<1x1xf32, #tpu.memory_space<vmem>>, vector<1x1xf32>
      tpu.vector_store %arg6[%c0_19, %c0_20], %29 {strides = array<i32>} : memref<1x1xf32, #tpu.memory_space<vmem>>, vector<1x1xf32>,
      %c0_21 = arith.constant 0 : index
      %31 = memref.load %arg1[%c0_21] : memref<1xi32, #tpu.memory_space<smem>>
      %c0_i32_22 = arith.constant 0 : i32
      %32 = arith.cmpi eq, %31, %c0_i32_22 : i32
      %33 = vector.extract_strided_slice %4 {offsets = [0, 0], sizes = [1, 1], strides = [1, 1]} : vector<16x1xf32> to vector<1x1xf32>
      %34 = vector.extract_strided_slice %4 {offsets = [1, 0], sizes = [1, 1], strides = [1, 1]} : vector<16x1xf32> to vector<1x1xf32>
      %35 = arith.select %32, %33, %34 : vector<1x1xf32>
      %c0_23 = arith.constant 0 : index
      %c0_24 = arith.constant 0 : index
      %36 = vector.load %arg7[%c0_23, %c0_24] : memref<1x1xf32, #tpu.memory_space<vmem>>, vector<1x1xf32>
      tpu.vector_store %arg7[%c0_23, %c0_24], %35 {strides = array<i32>} : memref<1x1xf32, #tpu.memory_space<vmem>>, vector<1x1xf32>,
    } else {
    }
    %c0_4 = arith.constant 0 : index
    %c0_5 = arith.constant 0 : index
    %8 = vector.load %arg5[%c0_4, %c0_5] : memref<1x1xf32, #tpu.memory_space<vmem>>, vector<1x1xf32>
    %cst_6 = arith.constant dense<0xFF800000> : vector<1xf32>
    %9 = vector.multi_reduction <maximumf>, %4, %cst_6 [0] : vector<16x1xf32> to vector<1xf32>
    %10 = vector.shape_cast %9 : vector<1xf32> to vector<1x1xf32>
    %11 = arith.maximumf %8, %10 : vector<1x1xf32>
    %c0_7 = arith.constant 0 : index
    %c0_8 = arith.constant 0 : index
    %12 = vector.load %arg6[%c0_7, %c0_8] : memref<1x1xf32, #tpu.memory_space<vmem>>, vector<1x1xf32>
    %13 = arith.subf %8, %11 : vector<1x1xf32>
    %14 = math.exp %13 : vector<1x1xf32>
    %15 = arith.mulf %12, %14 : vector<1x1xf32>
    %16 = vector.broadcast %11 : vector<1x1xf32> to vector<16x1xf32>
    %17 = arith.subf %4, %16 : vector<16x1xf32>
    %18 = math.exp %17 : vector<16x1xf32>
    %cst_9 = arith.constant dense<0.000000e+00> : vector<1xf32>
    %19 = vector.multi_reduction <add>, %18, %cst_9 [0] : vector<16x1xf32> to vector<1xf32>
    %20 = vector.shape_cast %19 : vector<1xf32> to vector<1x1xf32>
    %21 = arith.addf %15, %20 : vector<1x1xf32>
    %c0_10 = arith.constant 0 : index
    %c0_11 = arith.constant 0 : index
    %22 = vector.load %arg6[%c0_10, %c0_11] : memref<1x1xf32, #tpu.memory_space<vmem>>, vector<1x1xf32>
    tpu.vector_store %arg6[%c0_10, %c0_11], %21 {strides = array<i32>} : memref<1x1xf32, #tpu.memory_space<vmem>>, vector<1x1xf32>,
    %c0_12 = arith.constant 0 : index
    %c0_13 = arith.constant 0 : index
    %23 = vector.load %arg5[%c0_12, %c0_13] : memref<1x1xf32, #tpu.memory_space<vmem>>, vector<1x1xf32>
    tpu.vector_store %arg5[%c0_12, %c0_13], %11 {strides = array<i32>} : memref<1x1xf32, #tpu.memory_space<vmem>>, vector<1x1xf32>,
    %c3_i32 = arith.constant 3 : i32
    %24 = arith.cmpi eq, %arg0, %c3_i32 : i32
    %25 = arith.extui %24 : i1 to i32
    %c0_i32_14 = arith.constant 0 : i32
    %26 = arith.cmpi ne, %25, %c0_i32_14 : i32
    scf.if %26 {
      %c0_15 = arith.constant 0 : index
      %c0_16 = arith.constant 0 : index
      %27 = vector.load %arg5[%c0_15, %c0_16] : memref<1x1xf32, #tpu.memory_space<vmem>>, vector<1x1xf32>
      %c0_17 = arith.constant 0 : index
      %c0_18 = arith.constant 0 : index
      %28 = vector.load %arg6[%c0_17, %c0_18] : memref<1x1xf32, #tpu.memory_space<vmem>>, vector<1x1xf32>
      %29 = math.log %28 : vector<1x1xf32>
      %30 = arith.addf %27, %29 : vector<1x1xf32>
      %c0_19 = arith.constant 0 : index
      %c0_20 = arith.constant 0 : index
      %31 = vector.load %arg7[%c0_19, %c0_20] : memref<1x1xf32, #tpu.memory_space<vmem>>, vector<1x1xf32>
      %32 = arith.subf %30, %31 : vector<1x1xf32>
      %c0_21 = arith.constant 0 : index
      %c0_22 = arith.constant 0 : index
      %33 = vector.load %arg4[%c0_21, %c0_22] : memref<1x1xf32, #tpu.memory_space<vmem>>, vector<1x1xf32>
      tpu.vector_store %arg4[%c0_21, %c0_22], %32 {strides = array<i32>} : memref<1x1xf32, #tpu.memory_space<vmem>>, vector<1x1xf32>,
    } else {
    }
    return
  }
  func.func @transform_0(%arg0: i32, %arg1: memref<1xi32, #tpu.memory_space<smem>>) -> (i32, i32) {
    %c0_i32 = arith.constant 0 : i32
    %c0_i32_0 = arith.constant 0 : i32
    return %arg0, %c0_i32 : i32, i32
  }
  func.func @transform_1(%arg0: i32, %arg1: memref<1xi32, #tpu.memory_space<smem>>) -> (i32, i32) {
    %c0_i32 = arith.constant 0 : i32
    %c0_i32_0 = arith.constant 0 : i32
    return %arg0, %c0_i32 : i32, i32
  }
  func.func @transform_2(%arg0: i32, %arg1: memref<1xi32, #tpu.memory_space<smem>>) -> (i32, i32) {
    %c0_i32 = arith.constant 0 : i32
    %c0_i32_0 = arith.constant 0 : i32
    %c0_i32_1 = arith.constant 0 : i32
    return %c0_i32, %c0_i32_0 : i32, i32
  }
}

</mosaic_0001>

<bundles_post_ra>
// kernel: tpu_custom_call.1
= control target key start
LH: loop header
LB: loop body
LE: loop exit
PB: predicated region body
PF: predicated region fallthrough
CT: control target
= control target key end

     0   :  { %s787_s0 = inlined_call_operand.<no memory space> [shape: s32[1], index: 0, kind: input, shape index: {}]   ;;  %s788_s1 = inlined_call_operand.hbm [shape: f32[64,128], index: 1, kind: input, shape index: {}]   ;;  %s789_s2 = inlined_call_operand.hbm [shape: f32[64,128], index: 2, kind: input, shape index: {}]   ;;  %s790_s3 = inlined_call_operand.hbm [shape: f32[1,1], index: 3, kind: output, shape index: {}]  }
   0x1   :  { %8 = sst [smem:[#allocation6]] %s787_s0 }
   0x2   :  { %9 = vsyncpa [#allocation8], 0 }
   0x3   :  { %11 = vsyncpa [#allocation8 + $0x1], 0 }
   0x4   :  { %12 = vsyncpa [#allocation11], 0 }
   0x5   :  { %14 = vsyncpa [#allocation11 + $0x1], 0 }
   0x6   :  { %15 = vsyncpa [#allocation9], 0  ;;  %s596_s14 = smov 0   ;;  %s598_s15 = smov 0  }
   0x7   :  { %s600_s16 = smov 0   ;;  %s602_s17 = smov 0  }
   0x8 LB: > { %s615_s0 = sadd.s32 4294967295, %s564_s17   ;;  %s618_s18 = sadd.s32 1, %s564_s17   ;;  %s564_s17 = sphi %s602_s17, %s800_s17   ;;  %s560_s16 = sphi %s600_s16, %s799_s16   ;;  %s556_s15 = sphi %s598_s15, %s798_s15   ;;  %s552_s14 = sphi %s596_s14, %s797_s14  }
   0x9   : > { %s25_s19 = ssub.s32 %s564_s17, %s618_s18  ;;  %s28_s20 = sadd.s32 1, %s560_s16 }
   0xa   : > { %p26_p0 = scmp.eq.s32.totalorder %s25_s19, 0  ;;  %p35_p1 = scmp.ne.s32.totalorder %s560_s16, %s556_s15 }
   0xb   : > { %p36_p2 = scmp.eq.s32.totalorder %s564_s17, 0  ;;  %p41_p3 = scmp.ne.s32.totalorder %s556_s15, %s552_s14 }
   0xc   : > { %s628_s21 = scalar_select %p26_p0, %s560_s16, %s28_s20  }
   0xd   : > { %p37_p4 = por %p36_p2, %p35_p1  ;;  %p42_p5 = scmp.eq.s32.totalorder %s615_s0, 0 }
   0xe   : > { %p388_p6 = scmp.lt.s32.totalorder %s564_s17, 4  ;;  %s637_s23 = sand.u32 1, %s560_s16  }
   0xf   : > { %p632_p7 = por %p42_p5, %p41_p3  ;;  %s356_s24 = sshll.u32 %s637_s23, 4 }
  0x10   : > { %s371_s25 = sshll.u32 %s564_s17, 8  ;;  %s116_s29 = scalar_lea.vmem [#allocation7], %s356_s24 }
  0x11   : > { %s792_s22 = scalar_select %p632_p7, 1, 0 }
  0x12   : > { %s646_s28 = scalar_lea.hbm %s788_s1, %s371_s25  ;;  %s123_s30 = sshll.u32 %s116_s29, 4  ;;  %s650_s30 = int_to_ptr.vmem [resolvable:$true] %s123_s30 }
  0x13   : > { %p652_p8 = pnand %p388_p6, %p37_p4  ;;  %s113_s5 = scalar_lea.sflag [#allocation8], %s637_s23 }
  0x14   : > { %s436_s6 = scalar_lea.hbm %s646_s28, 256  ;;  %s441_s9 = scalar_lea.hbm %s788_s1, 1024 }
  0x15   : > { %p437_p10 = scmp.ne.s32.totalorder %s646_s28, %s436_s6  ;;  %p438_p11 = pneg %p652_p8 }
  0x16   : > { %p442_p0 = scmp.lt.u32.totalorder %s646_s28, %s788_s1  ;;  %p443_p1 = scmp.lt.u32.totalorder %s441_s9, %s436_s6 }
  0x17   : > { %p439_p12 = pnand %p438_p11, %p437_p10  ;;  %p445_p3 = scmp.lt.u32.totalorder %s436_s6, %s646_s28 }
  0x18   : > { %p444_p2 = por %p443_p1, %p442_p0 }
  0x19   : > { %p440_p13 = pneg %p439_p12 }
  0x1a   : > { %p446_p4 = por %p445_p3, %p444_p2 }
  0x1c   : > { %p447_p5 = pnand %p446_p4, %p440_p13 }
  0x1e   : > { %450 = shalt.err (!%p447_p5)
}
  0x1f   : > { %s451_s12 = scalar_lea.vmem %s650_s30, 256  ;;  %s566_s13 = smov [#allocation7]  }
  0x20   : > { %p452_p6 = scmp.ne.s32.totalorder %s650_s30, %s451_s12  ;;  %s456_s14 = sshll.u32 %s566_s13, 4  ;;  %s457_s14 = int_to_ptr.vmem [resolvable:$false] %s456_s14 }
  0x21   : > { %s458_s19 = scalar_lea.vmem %s457_s14, 512  ;;  %p459_p9 = scmp.lt.s32.totalorder %s650_s30, %s457_s14 }
  0x22   : > { %p454_p10 = pnand %p452_p6, %p438_p11  ;;  %p460_p0 = scmp.lt.s32.totalorder %s458_s19, %s451_s12 }
  0x24   : > { %p455_p12 = pneg %p454_p10  ;;  %p461_p1 = por %p460_p0, %p459_p9 }
  0x26   : > { %p462_p2 = pnand %p461_p1, %p455_p12 }
  0x28   : > { %465 = shalt.err (!%p462_p2)
}
  0x29   : > { %s567_s20 = smov 128   ;;  %s568_s26 = smov 8  }
  0x2a   : > { %384 = dma.hbm_to_vmem [thread:$0]  (!%p652_p8), %s646_s28, 256, %s650_s30, %s113_s5, %s567_s20, %s567_s20, %s568_s26  }
  0x2b   : > { %p152_p9 = scmp.lt.s32.totalorder %s564_s17, 5  ;;  %s694_s6 = scalar_lea.hbm %s789_s2, %s371_s25 }
  0x2c   : > { %p794_p13 = scmp.ge.s32.totalorder %s564_s17, 1  ;;  %s137_s8 = scalar_lea.vmem [#allocation10], %s356_s24 }
  0x2d   : > { %s144_s9 = sshll.u32 %s137_s8, 4  ;;  %s134_s28 = scalar_lea.sflag [#allocation11], %s637_s23  ;;  %s704_s9 = int_to_ptr.vmem [resolvable:$true] %s144_s9 }
  0x2e   : > { %p698_p3 = pnand %p794_p13, %p152_p9  ;;  %s466_s30 = scalar_lea.hbm %s694_s6, 256 }
  0x2f   : > { %p467_p4 = scmp.ne.s32.totalorder %s694_s6, %s466_s30  ;;  %s471_s5 = scalar_lea.hbm %s789_s2, 1024 }
  0x30   : > { %p472_p10 = scmp.lt.u32.totalorder %s694_s6, %s789_s2  ;;  %p473_p12 = scmp.lt.u32.totalorder %s471_s5, %s466_s30 }
  0x31   : > { %p469_p5 = pnand %p467_p4, %p438_p11  ;;  %p475_p1 = scmp.lt.u32.totalorder %s466_s30, %s694_s6 }
  0x32   : > { %p474_p0 = por %p473_p12, %p472_p10 }
  0x33   : > { %p470_p6 = pneg %p469_p5 }
  0x34   : > { %p476_p2 = por %p475_p1, %p474_p0 }
  0x36   : > { %p477_p9 = pnand %p476_p2, %p470_p6 }
  0x38   : > { %480 = shalt.err (!%p477_p9)
}
  0x39   : > { %s481_s24 = scalar_lea.vmem %s704_s9, 256  ;;  %s569_s12 = smov [#allocation10]  }
  0x3a   : > { %p482_p13 = scmp.ne.s32.totalorder %s704_s9, %s481_s24  ;;  %s486_s13 = sshll.u32 %s569_s12, 4  ;;  %s487_s13 = int_to_ptr.vmem [resolvable:$false] %s486_s13 }
  0x3b   : > { %s488_s14 = scalar_lea.vmem %s487_s13, 512  ;;  %p489_p7 = scmp.lt.s32.totalorder %s704_s9, %s487_s13 }
  0x3c   : > { %p484_p4 = pnand %p482_p13, %p438_p11  ;;  %p490_p10 = scmp.lt.s32.totalorder %s488_s14, %s481_s24 }
  0x3e   : > { %p485_p5 = pneg %p484_p4  ;;  %p491_p12 = por %p490_p10, %p489_p7 }
  0x40   : > { %p492_p0 = pnand %p491_p12, %p485_p5 }
  0x42   : > { %495 = shalt.err (!%p492_p0)
}
  0x43   : > { %387 = dma.hbm_to_vmem [thread:$0]  (!%p652_p8), %s694_s6, 256, %s704_s9, %s134_s28, %s567_s20, %s567_s20, %s568_s26  }
  0x44   : > { %156 = sbr.rel (%p698_p3) target bundleno = 336 (0x150), region = 28  ;;  %s158_s19 = sand.u32 (!%p698_p3), 1, %s556_s15  }
  0x45   : > { %s363_s27 = sshll.u32 (!%p698_p3), %s158_s19, 4  ;;  %s159_s29 = scalar_lea.sflag (!%p698_p3), [#allocation8], %s158_s19 }
  0x46   : > { %s162_s8 = scalar_lea.vmem (!%p698_p3), [#allocation7], %s363_s27  ;;  %p796_p7 = scmp.ne.s32.totalorder (!%p698_p3), %s792_s22, 0 }
  0x4b   : > { %539 = dma.done.wait (%p796_p7), %s159_s29, 256  }
  0x4c   : > { %541 = vsyncadd (%p796_p7), %s159_s29, 4294967040  ;;  %s168_s4 = scalar_lea.sflag [#allocation11], %s158_s19  ;;  %s171_s23 = scalar_lea.vmem [#allocation10], %s363_s27 }
  0x4d   : > { %543 = dma.done.wait (%p796_p7), %s168_s4, 256  }
  0x4e   : > { %545 = vsyncadd (%p796_p7), %s168_s4, 4294967040  ;;  %v194_v0 = vld [vmem:[%s162_s8] sm:$0xff]  ;;  %v195_v2 = vld [vmem:[%s162_s8 + $0x8] sm:$0xff]  ;;  %p365_p8 = scmp.ne.s32.totalorder %s615_s0, 0 }
  0x4f   : > { %v196_v1 = vld [vmem:[%s171_s23] sm:$0xff]  ;;  %v197_v4 = vld [vmem:[%s171_s23 + $0x8] sm:$0xff]  ;;  %vm208_vm0 = vcmask (!%p365_p8), 0   ;;  %s211_s20 = sld [smem:[#allocation6]] (!%p365_p8)  ;;  %v570_v8 = vmov (!%p365_p8), -inf   ;;  %v571_v9 = vmov (!%p365_p8), 0.0  }
  0x50   : > { %v198_v3 = vmul.f32 %v196_v1, %v194_v0  ;;  %v199_v5 = vmul.f32 %v197_v4, %v195_v2  ;;  %209 = vst.msk [vmem:[#allocation2] sm:$0x1] (!%p365_p8), %vm208_vm0, %v570_v8  ;;  %210 = vst.msk [vmem:[#allocation3] sm:$0x1] (!%p365_p8), %vm208_vm0, %v571_v9 }
  0x52   : > { %200 = vadd.xlane.f32.xlu0 %v198_v3 }
  0x55   : > { %p212_p11 = scmp.eq.s32.totalorder (!%p365_p8), %s211_s20, 0 }
  0x56   : > { %202 = vadd.xlane.f32.xlu0 %v199_v5 }
  0xdd   : > { %207 = sbr.rel (%p365_p8) target bundleno = 234 (0xea), region = 40 }
  0xdf   : > { %v201_v6 = vpop.xlane.xlu0 %200 }
  0xe0   : > { %v217_v10 = vrot.slane (!%p365_p8), %v201_v6, 1 }
  0xe3   : > { %v203_v7 = vpop.xlane.xlu0 %202 }
  0xe4   : > { %s213_s22 = scalar_select %p212_p11, 1, 0 }
  0xe6   : > { %v214_v11 = vstv %s213_s22 }
  0xe7   : > { %vm215_vm1 = vcmp.eq.s32.totalorder %v214_v11, 1 }
  0xe8   : > { %v219_v12 = vsel %vm215_vm1, %v201_v6, %v217_v10 }
  0xe9   : > { %220 = vst.msk [vmem:[#allocation4] sm:$0x1] %vm208_vm0, %v219_v12 }
  0xea PF: > { %v222_v13 = vmax.f32 %v201_v6, %v203_v7  ;;  %v236_v16 = vlaneseq  ;;  %v221_v21 = vld [vmem:[#allocation2] sm:$0x1]  ;;  %vm258_vm2 = vcmask 0   ;;  %vm247_vm3 = vcmask 7168   ;;  %v230_v41 = vld [vmem:[#allocation3] sm:$0x1] }
  0xeb   : > { %p366_p3 = scmp.ne.s32.totalorder %s615_s0, 3 }
  0xec   : > { %v223_v14 = vrot.slane %v222_v13, 4  ;;  %v237_v19 = vshrl.u32 %v236_v16, 7 }
  0xee   : > { %v224_v15 = vmax.f32 %v222_v13, %v223_v14  ;;  %v238_v23 = vsub.s32 0, %v237_v19 }
  0xf0   : > { %v225_v17 = vrot.slane %v224_v15, 2  ;;  %v270_v51 = vld [vmem:[#allocation4] sm:$0x1] (!%p366_p3) }
  0xf2   : > { %v226_v18 = vmax.f32 %v224_v15, %v225_v17 }
  0xf4   : > { %v227_v20 = vrot.slane %v226_v18, 1 }
  0xf6   : > { %v228_v22 = vmax.f32 %v226_v18, %v227_v20 }
  0xf8   : > { %v229_v24 = vmax.f32 %v221_v21, %v228_v22 }
  0xfa   : > { %v239_v25 = vrot.slane %v229_v24, %v238_v23  ;;  %260 = vst.msk [vmem:[#allocation2] sm:$0x1] %vm258_vm2, %v229_v24  ;;  %v231_v30 = vsub.f32 %v221_v21, %v229_v24 }
  0xfc   : > { %v241_v26 = vsub.f32 %v201_v6, %v239_v25  ;;  %v242_v27 = vsub.f32 %v203_v7, %v239_v25  ;;  %v232_v31 = vmul.f32 1.442695, %v231_v30 }
  0xfe   : > { %v243_v28 = vmul.f32 1.442695, %v241_v26  ;;  %v245_v29 = vmul.f32 1.442695, %v242_v27 }
 0x100   : > { %428 = vpow2.f32 %v243_v28 }
 0x101   : > { %430 = vpow2.f32 %v245_v29  ;;  %v265_v49 = vld [vmem:[#allocation2] sm:$0x1] (!%p366_p3) }
 0x102   : > { %432 = vpow2.f32 %v232_v31 }
 0x10a   : > { %v429_v32 = vpop.eup %428 }
 0x10b   : > { %v431_v33 = vpop.eup %430  ;;  %v248_v34 = vsel %vm247_vm3, %v429_v32, 0.0 }
 0x10c   : > { %v249_v35 = vsel %vm247_vm3, %v431_v33, 0.0  ;;  %v433_v40 = vpop.eup %432 }
 0x10d   : > { %v250_v36 = vadd.f32 %v249_v35, %v248_v34  ;;  %v234_v43 = vmul.f32 %v433_v40, %v230_v41 }
 0x10f   : > { %v251_v37 = vrot.slane %v250_v36, 4 }
 0x111   : > { %v252_v38 = vadd.f32 %v251_v37, %v250_v36 }
 0x113   : > { %v253_v39 = vrot.slane %v252_v38, 2 }
 0x115   : > { %v254_v42 = vadd.f32 %v253_v39, %v252_v38 }
 0x117   : > { %v255_v44 = vrot.slane %v254_v42, 1  ;;  %264 = sbr.rel (%p366_p3) target bundleno = 311 (0x137), region = 44 }
 0x119   : > { %v256_v45 = vadd.f32 %v255_v44, %v254_v42 }
 0x11b   : > { %v257_v46 = vadd.f32 %v256_v45, %v234_v43 }
 0x11d   : > { %259 = vst.msk [vmem:[#allocation3] sm:$0x1] %vm258_vm2, %v257_v46 }
 0x124   : > { %v266_v47 = vld [vmem:[#allocation3] sm:$0x1] }
 0x125   : > { %434 = vlog2.f32 %v266_v47 }
 0x12f   : > { %v435_v48 = vpop.eup %434 }
 0x130   : > { %v268_v50 = vmul.f32 0.6931472, %v435_v48 }
 0x132   : > { %v269_v52 = vadd.f32 %v268_v50, %v265_v49 }
 0x134   : > { %v271_v53 = vsub.f32 %v269_v52, %v270_v51 }
 0x136   : > { %272 = vst.msk [vmem:[#allocation12] sm:$0x1] %vm258_vm2, %v271_v53 }
 0x137 PF: > { %p389_p6 = scmp.eq.s32.totalorder %s615_s0, 3  ;;  %s572_s26 = smov [#allocation12]  }
 0x138   : > { %s280_s6 = sshll.u32 %s572_s26, 4  ;;  %s281_s6 = int_to_ptr.vmem [resolvable:$true] %s280_s6 }
 0x139   : > { %s496_s7 = scalar_lea.vmem %s281_s6, 16  ;;  %s502_s9 = scalar_lea.vmem %s281_s6, 32 }
 0x13a   : > { %p497_p1 = scmp.ne.s32.totalorder %s281_s6, %s496_s7  ;;  %p503_p13 = scmp.lt.s32.totalorder %s281_s6, %s281_s6 }
 0x13b   : > { %p504_p4 = scmp.lt.s32.totalorder %s502_s9, %s496_s7 }
 0x13c   : > { %p498_p2 = pnand %p497_p1, %p389_p6 }
 0x13d   : > { %p505_p5 = por %p504_p4, %p503_p13 }
 0x13e   : > { %p499_p9 = pneg %p498_p2 }
 0x140   : > { %p506_p10 = pnand %p505_p5, %p499_p9 }
 0x142   : > { %509 = shalt.err (!%p506_p10)
}
 0x143   : > { %s510_s17 = scalar_lea.hbm %s790_s3, 16 }
 0x144   : > { %p511_p12 = scmp.ne.s32.totalorder %s790_s3, %s510_s17  ;;  %p516_p8 = scmp.lt.u32.totalorder %s510_s17, %s790_s3 }
 0x146   : > { %p512_p0 = pnand %p511_p12, %p389_p6 }
 0x148   : > { %p513_p7 = pneg %p512_p0 }
 0x14a   : > { %p518_p11 = pnand %p516_p8, %p513_p7 }
 0x14c   : > { %521 = shalt.err (!%p518_p11)
}
 0x14d   : > { %378 = dma.vmem_to_hbm [thread:$0]  (%p389_p6), %s281_s6, 16, %s790_s3, [#allocation9]  }
 0x14e   : > { %547 = dma.done.wait (%p389_p6), [#allocation9], 16  }
 0x14f   : > { %549 = vsyncadd (%p389_p6), [#allocation9], 4294967280 }
 0x150 PF: > { %p18_p3 = scmp.ge.s32.totalorder %s618_s18, 6   ;;  %s797_s14 = smov %s556_s15 }
 0x151   : > { %s798_s15 = smov %s560_s16  ;;  %s799_s16 = smov %s628_s21 }
 0x152   : > { %s800_s17 = smov %s618_s18  ;;  %20 = sbr.rel (!%p18_p3) target bundleno = 8 (0x8), region = 86 }
 0x159   :  { %293 = vsyncpa [#allocation8], 1 }
 0x15a   :  { %295 = vsyncpa [#allocation8 + $0x1], 1 }
 0x15b   :  { %296 = vsyncpa [#allocation11], 1 }
 0x15c   :  { %298 = vsyncpa [#allocation11 + $0x1], 1 }
 0x15d   :  { %299 = vsyncpa [#allocation9], 1 }
 0x15e   :  { %301 = vsyncpa [#allocation9 + $0x1], 1 }

</bundles_post_ra>
